<compile_context>
chip_gen: v5e
topology: v5e:2x2
jax: 0.10.0
libtpu: 0.0.40
codegen_flags: <defaults>
</compile_context>

<pallas_src>
import functools
import math

import jax
import jax.numpy as jnp
from jax.experimental import pallas as pl
from jax.experimental.pallas import tpu as pltpu


# ----------------------------------------------------------------------------
# Small helpers (padding / tile selection / VMEM budgeting)
# ----------------------------------------------------------------------------
def _round_up(n, m):
    return ((n + m - 1) // m) * m


def _choose_tile(n, max_tile=512):
    """Pick a row tile (multiple of 128) and the padded extent it divides."""
    t = min(max_tile, _round_up(n, 128))
    return t, _round_up(n, t)


def _pad2(x, rows, cols):
    r, c = x.shape
    return jnp.pad(x, ((0, rows - r), (0, cols - c)))


def _gat_vmem_bytes(tm, tk, Kp, Hp, other_resident):
    """Rough (conservative) VMEM footprint of one fused_gat invocation."""
    bf = 2
    total = 0
    total += 2 * tm * tk * bf                       # adj tile, double-buffered
    total += (2 * Kp * Hp * bf) if other_resident else (2 * tk * Hp * bf)
    total += 2 * tm * Hp * bf                       # self tile
    total += 2 * tm * Hp * bf                       # output tile
    total += 2 * 2 * Hp * Hp * bf                   # W_self + W_agg (worst case)
    total += 2 * Hp * 4                             # bias
    total += tm * Hp * 4                            # f32 accumulator scratch
    return total


# ----------------------------------------------------------------------------
# Pallas kernels
# ----------------------------------------------------------------------------
def _gat_kernel(adj_ref, other_ref, self_ref, wself_ref, wagg_ref, b_ref,
                o_ref, acc_ref, *, tk, other_resident):
    # Fused:  out = relu(self @ W_self + (adj @ other) @ W_agg + b)
    # Grid: (batch, M tiles, K reduction tiles).
    # acc (f32 VMEM) accumulates ONLY agg = sum_k adj_tile @ other_tile;
    # the weight matmuls / bias / ReLU happen once in the final k step.
    k = pl.program_id(2)

    @pl.when(k == 0)
    def _():
        acc_ref[...] = jnp.zeros_like(acc_ref)

    if other_resident:
        start = pl.multiple_of(k * tk, tk)
        other = other_ref[pl.ds(start, tk), :]
    else:
        other = other_ref[...]
    acc_ref[...] += jnp.dot(adj_ref[...], other,
                            preferred_element_type=jnp.float32)

    @pl.when(k == pl.num_programs(2) - 1)
    def _():
        out = jnp.dot(self_ref[...], wself_ref[...],
                      preferred_element_type=jnp.float32)
        out += jnp.dot(acc_ref[...].astype(jnp.bfloat16), wagg_ref[...],
                       preferred_element_type=jnp.float32)
        o_ref[...] = jnp.maximum(out + b_ref[...], 0.0).astype(o_ref.dtype)


def _sub_score_kernel(d_ref, p_ref, wt_ref, wb_ref, bsub_ref, ws_ref, bdisc_ref,
                      o_ref):
    # Fused lin_sub + sigmoid + bilinear discriminator + sigmoid.
    pre = jnp.dot(d_ref[...], wt_ref[...], preferred_element_type=jnp.float32)
    pre += jnp.dot(p_ref[...], wb_ref[...], preferred_element_type=jnp.float32)
    sub = jax.nn.sigmoid(pre + bsub_ref[...])                       # (tm, Hp)
    score = jnp.sum(sub * ws_ref[...], axis=-1, keepdims=True)      # (tm, 1)
    prob = jax.nn.sigmoid(score + bdisc_ref[0])                     # SMEM scalar
    # Lane-dense store: broadcast the score across 128 lanes; wrapper takes col 0.
    o_ref[...] = jnp.broadcast_to(prob, o_ref.shape)


# ----------------------------------------------------------------------------
# pallas_call wrappers
# ----------------------------------------------------------------------------
def fused_gat(adj2, other2, self2, w_self, w_agg, bias, *, tm, tk):
    """adj2:(2,Mp,Kp) bf16, other2:(2,Kp,Hp) bf16, self2:(2,Mp,Hp) bf16,
       w_self/w_agg:(Hp,Hp) bf16, bias:(1,Hp) f32 -> (2,Mp,Hp) bf16."""
    _, Mp, Kp = adj2.shape
    Hp = w_self.shape[1]
    grid = (2, Mp // tm, Kp // tk)

    # Keep the whole `other` feature matrix VMEM-resident per batch when small;
    # otherwise stream tk-row tiles along the reduction axis.
    other_resident = (Kp * Hp * 2) <= (8 << 20)
    if other_resident:
        other_spec = pl.BlockSpec((None, Kp, Hp), lambda b, i, k: (b, 0, 0))
    else:
        other_spec = pl.BlockSpec((None, tk, Hp), lambda b, i, k: (b, k, 0))

    vmem_est = _gat_vmem_bytes(tm, tk, Kp, Hp, other_resident)
    vmem_limit = int(min(64 << 20, max(32 << 20, 2 * vmem_est)))

    kernel = functools.partial(_gat_kernel, tk=tk, other_resident=other_resident)
    return pl.pallas_call(
        kernel,
        out_shape=jax.ShapeDtypeStruct((2, Mp, Hp), jnp.bfloat16),
        grid_spec=pltpu.PrefetchScalarGridSpec(
            num_scalar_prefetch=0,
            grid=grid,
            in_specs=[
                pl.BlockSpec((None, tm, tk), lambda b, i, k: (b, i, k)),
                other_spec,
                pl.BlockSpec((None, tm, Hp), lambda b, i, k: (b, i, 0)),
                pl.BlockSpec((Hp, Hp), lambda b, i, k: (0, 0)),
                pl.BlockSpec((Hp, Hp), lambda b, i, k: (0, 0)),
                pl.BlockSpec((1, Hp), lambda b, i, k: (0, 0)),
            ],
            out_specs=pl.BlockSpec((None, tm, Hp), lambda b, i, k: (b, i, 0)),
            scratch_shapes=[pltpu.VMEM((tm, Hp), jnp.float32)],
        ),
        compiler_params=pltpu.CompilerParams(
            dimension_semantics=("parallel", "parallel", "arbitrary"),
            vmem_limit_bytes=vmem_limit),
    )(adj2, other2, self2, w_self, w_agg, bias)


def fused_sub_score(d, p, w_top, w_bot, b_sub, ws_row, b_disc, *, tm):
    """d/p:(Mp,Hp) bf16, w_top/w_bot:(Hp,Hp) bf16, b_sub/ws_row:(1,Hp) f32,
       b_disc:(1,) f32 (SMEM scalar) -> lane-dense score slab (Mp,128) f32."""
    Mp, Hp = d.shape
    grid = (Mp // tm,)
    return pl.pallas_call(
        _sub_score_kernel,
        out_shape=jax.ShapeDtypeStruct((Mp, 128), jnp.float32),
        grid_spec=pltpu.PrefetchScalarGridSpec(
            num_scalar_prefetch=0,
            grid=grid,
            in_specs=[
                pl.BlockSpec((tm, Hp), lambda i: (i, 0)),
                pl.BlockSpec((tm, Hp), lambda i: (i, 0)),
                pl.BlockSpec((Hp, Hp), lambda i: (0, 0)),
                pl.BlockSpec((Hp, Hp), lambda i: (0, 0)),
                pl.BlockSpec((1, Hp), lambda i: (0, 0)),
                pl.BlockSpec((1, Hp), lambda i: (0, 0)),
                pl.BlockSpec(memory_space=pltpu.MemorySpace.SMEM),
            ],
            out_specs=pl.BlockSpec((tm, 128), lambda i: (i, 0)),
        ),
        compiler_params=pltpu.CompilerParams(
            dimension_semantics=("parallel",)),
    )(d, p, w_top, w_bot, b_sub, ws_row, b_disc)


# ----------------------------------------------------------------------------
# Parameter initialization (deterministic, xavier-uniform like the module)
# ----------------------------------------------------------------------------
def xavier_uniform(key, fan_in, fan_out, shape):
    bound = math.sqrt(6.0 / (fan_in + fan_out))
    return jax.random.uniform(key, shape, jnp.float32, -bound, bound)


def init_params(hidden, key):
    keys = jax.random.split(key, 5)
    return {
        # self.lin : Linear(2H -> H), stored transposed as (2H, H)
        "lin_w": xavier_uniform(keys[0], 2 * hidden, hidden, (2 * hidden, hidden)),
        "lin_b": jnp.zeros((1, hidden), jnp.float32),
        # self.lin_sub : Linear(2H -> H)
        "lin_sub_w": xavier_uniform(keys[1], 2 * hidden, hidden, (2 * hidden, hidden)),
        "lin_sub_b": jnp.zeros((1, hidden), jnp.float32),
        # self.disc.f_k : Bilinear(H, H, 1)  (weight (1,H,H) -> stored (H,H))
        "disc_w": xavier_uniform(keys[2], hidden, hidden, (hidden, hidden)),
        "disc_b": jnp.zeros((1,), jnp.float32),
        # GAT stand-in: Linear(2H -> H) on drug side / protein side
        "gat_u_w": xavier_uniform(keys[3], 2 * hidden, hidden, (2 * hidden, hidden)),
        "gat_u_b": jnp.zeros((1, hidden), jnp.float32),
        "gat_v_w": xavier_uniform(keys[4], 2 * hidden, hidden, (2 * hidden, hidden)),
        "gat_v_b": jnp.zeros((1, hidden), jnp.float32),
    }


# ----------------------------------------------------------------------------
# Model forward
# ----------------------------------------------------------------------------
def my_dgi_forward(params,
                   drug_hidden_out, protein_hidden_out,
                   fake_drug_hidden_out, fake_protein_hidden_out,
                   UV_adj, VU_adj, CUV_adj, CVU_adj,
                   drug_One, protein_One):
    bf = jnp.bfloat16
    n_drug, H = drug_hidden_out.shape
    n_prot = protein_hidden_out.shape[0]
    n_pairs = drug_One.shape[0]
    Hp = _round_up(H, 128)

    # ---- AvgReadout + S_Two path (tiny 1-row ops: keep in plain JAX/XLA) ----
    S_u = jnp.mean(drug_hidden_out, axis=0, keepdims=True)        # (1, H)
    S_i = jnp.mean(protein_hidden_out, axis=0, keepdims=True)     # (1, H)
    S_cat = jnp.concatenate([S_u, S_i], axis=1)                   # (1, 2H)
    S_Two = jax.nn.sigmoid(S_cat @ params["lin_w"] + params["lin_b"])  # (1, H)
    # Bilinear reduced to a matvec: ws[h] = sum_j disc_w[h, j] * S_Two[j]
    ws_row = S_Two @ params["disc_w"].T                           # (1, H)

    # ---- tile sizes & zero-padding (exact: padded weights are zero) ----
    tm_drug, Nd_pad = _choose_tile(n_drug)
    tm_prot, Np_pad = _choose_tile(n_prot)

    drug_feats = jnp.stack([_pad2(drug_hidden_out, Nd_pad, Hp),
                            _pad2(fake_drug_hidden_out, Nd_pad, Hp)]).astype(bf)
    prot_feats = jnp.stack([_pad2(protein_hidden_out, Np_pad, Hp),
                            _pad2(fake_protein_hidden_out, Np_pad, Hp)]).astype(bf)
    uv = jnp.stack([_pad2(UV_adj, Nd_pad, Np_pad),
                    _pad2(CUV_adj, Nd_pad, Np_pad)]).astype(bf)
    vu = jnp.stack([_pad2(VU_adj, Np_pad, Nd_pad),
                    _pad2(CVU_adj, Np_pad, Nd_pad)]).astype(bf)

    # split GAT weights: concat([self, agg]) @ W == self @ W[:H] + agg @ W[H:]
    gat_u_self = _pad2(params["gat_u_w"][:H], Hp, Hp).astype(bf)
    gat_u_agg = _pad2(params["gat_u_w"][H:], Hp, Hp).astype(bf)
    gat_u_b = _pad2(params["gat_u_b"], 1, Hp)
    gat_v_self = _pad2(params["gat_v_w"][:H], Hp, Hp).astype(bf)
    gat_v_agg = _pad2(params["gat_v_w"][H:], Hp, Hp).astype(bf)
    gat_v_b = _pad2(params["gat_v_b"], 1, Hp)

    # ---- fused GAT, real + fake batched along a leading grid axis ----
    drug_out = fused_gat(uv, prot_feats, drug_feats,
                         gat_u_self, gat_u_agg, gat_u_b,
                         tm=tm_drug, tk=tm_prot)                  # (2, Nd_pad, Hp)
    prot_out = fused_gat(vu, drug_feats, prot_feats,
                         gat_v_self, gat_v_agg, gat_v_b,
                         tm=tm_prot, tk=tm_drug)                  # (2, Np_pad, Hp)

    # ---- row gather (index_select) in XLA, real+fake batched along M ----
    d_rows = jnp.concatenate([jnp.take(drug_out[0], drug_One, axis=0),
                              jnp.take(drug_out[1], drug_One, axis=0)], axis=0)
    p_rows = jnp.concatenate([jnp.take(prot_out[0], protein_One, axis=0),
                              jnp.take(prot_out[1], protein_One, axis=0)], axis=0)
    m_total = 2 * n_pairs
    tm_pairs, Mp_pairs = _choose_tile(m_total)
    d_rows = jnp.pad(d_rows, ((0, Mp_pairs - m_total), (0, 0)))
    p_rows = jnp.pad(p_rows, ((0, Mp_pairs - m_total), (0, 0)))

    # split lin_sub weights the same way
    sub_top = _pad2(params["lin_sub_w"][:H], Hp, Hp).astype(bf)
    sub_bot = _pad2(params["lin_sub_w"][H:], Hp, Hp).astype(bf)
    sub_b = _pad2(params["lin_sub_b"], 1, Hp)
    ws_p = _pad2(ws_row, 1, Hp)

    # ---- fused lin_sub + sigmoid + discriminator + sigmoid ----
    score_slab = fused_sub_score(d_rows, p_rows, sub_top, sub_bot, sub_b,
                                 ws_p, params["disc_b"], tm=tm_pairs)
    prob = score_slab[:m_total, 0]                                # (2*n_pairs,)
    label = jnp.concatenate([jnp.ones((n_pairs,), jnp.float32),
                             jnp.zeros((n_pairs,), jnp.float32)])
    return prob, label


# ----------------------------------------------------------------------------
# Demo
# ----------------------------------------------------------------------------
if __name__ == "__main__":
    hidden = 32
    n_drug = 8
    n_protein = 8
    n_pairs = 8

    key = jax.random.PRNGKey(0)
    keys = jax.random.split(key, 12)

    params = init_params(hidden, keys[0])

    drug_hidden_out = jax.random.normal(keys[1], (n_drug, hidden), jnp.float32)
    protein_hidden_out = jax.random.normal(keys[2], (n_protein, hidden), jnp.float32)
    fake_drug_hidden_out = jax.random.normal(keys[3], (n_drug, hidden), jnp.float32)
    fake_protein_hidden_out = jax.random.normal(keys[4], (n_protein, hidden), jnp.float32)

    UV_adj = (jax.random.uniform(keys[5], (n_drug, n_protein)) > 0.5).astype(jnp.float32)
    VU_adj = UV_adj.T
    CUV_adj = (jax.random.uniform(keys[6], (n_drug, n_protein)) > 0.5).astype(jnp.float32)
    CVU_adj = CUV_adj.T

    drug_One = jax.random.randint(keys[7], (n_pairs,), 0, n_drug, jnp.int32)
    protein_One = jax.random.randint(keys[8], (n_pairs,), 0, n_protein, jnp.int32)

    prob, label = my_dgi_forward(
        params,
        drug_hidden_out, protein_hidden_out,
        fake_drug_hidden_out, fake_protein_hidden_out,
        UV_adj, VU_adj, CUV_adj, CVU_adj,
        drug_One, protein_One,
    )
    jax.block_until_ready((prob, label))

    assert prob.shape == (2 * n_pairs,)
    assert label.shape == (2 * n_pairs,)
    assert bool(jnp.all(jnp.isfinite(prob)))
    assert bool(jnp.all((prob >= 0.0) & (prob <= 1.0)))
    print("KERNEL_OK")
</pallas_src>

<mosaic_0001>
module attributes {stable_mosaic.version = 11 : i64} {
  func.func @_gat_kernel(%arg0: i32, %arg1: i32, %arg2: i32, %arg3: memref<1x128x128xbf16, #tpu.memory_space<vmem>>, %arg4: memref<1x128x128xbf16, #tpu.memory_space<vmem>>, %arg5: memref<1x128x128xbf16, #tpu.memory_space<vmem>>, %arg6: memref<128x128xbf16, #tpu.memory_space<vmem>>, %arg7: memref<128x128xbf16, #tpu.memory_space<vmem>>, %arg8: memref<1x128xf32, #tpu.memory_space<vmem>>, %arg9: memref<1x128x128xbf16, #tpu.memory_space<vmem>>, %arg10: memref<128x128xf32, #tpu.memory_space<vmem>>) attributes {dimension_semantics = [#tpu.dimension_semantics<parallel>, #tpu.dimension_semantics<parallel>, #tpu.dimension_semantics<arbitrary>], iteration_bounds = array<i64: 2, 1, 1>, scalar_prefetch = 0 : i64, scratch_operands = 1 : i64, tpu.core_type = #tpu.core_type<tc>, window_params = [{transform_indices = @transform_0, window_bounds = array<i64: 1, 128, 128>}, {transform_indices = @transform_1, window_bounds = array<i64: 1, 128, 128>}, {transform_indices = @transform_2, window_bounds = array<i64: 1, 128, 128>}, {pipeline_mode = #tpu.pipeline_mode<synchronous>, transform_indices = @transform_3, window_bounds = array<i64: 128, 128>}, {pipeline_mode = #tpu.pipeline_mode<synchronous>, transform_indices = @transform_4, window_bounds = array<i64: 128, 128>}, {pipeline_mode = #tpu.pipeline_mode<synchronous>, transform_indices = @transform_5, window_bounds = array<i64: 1, 128>}, {transform_indices = @transform_6, window_bounds = array<i64: 1, 128, 128>}]} {
    %c0_i32 = arith.constant 0 : i32
    %0 = arith.cmpi eq, %arg2, %c0_i32 : i32
    %1 = arith.extui %0 : i1 to i32
    %c0_i32_0 = arith.constant 0 : i32
    %2 = arith.cmpi ne, %1, %c0_i32_0 : i32
    scf.if %2 {
      %cst_11 = arith.constant 0.000000e+00 : f32
      %17 = vector.broadcast %cst_11 : f32 to vector<128x128xf32>
      %c0_12 = arith.constant 0 : index
      %c0_13 = arith.constant 0 : index
      %18 = vector.load %arg10[%c0_12, %c0_13] : memref<128x128xf32, #tpu.memory_space<vmem>>, vector<128x128xf32>
      tpu.vector_store %arg10[%c0_12, %c0_13], %17 {strides = array<i32>} : memref<128x128xf32, #tpu.memory_space<vmem>>, vector<128x128xf32>,
    } else {
    }
    %c128_i32 = arith.constant 128 : i32
    %3 = arith.muli %arg2, %c128_i32 : i32
    %4 = tpu.assume_multiple %3, 128 : i32
    %c0 = arith.constant 0 : index
    %5 = arith.index_cast %4 : i32 to index
    %c0_1 = arith.constant 0 : index
    %6 = vector.load %arg4[%c0, %5, %c0_1] : memref<1x128x128xbf16, #tpu.memory_space<vmem>>, vector<1x128x128xbf16>
    %7 = vector.shape_cast %6 : vector<1x128x128xbf16> to vector<128x128xbf16>
    %c0_2 = arith.constant 0 : index
    %c0_3 = arith.constant 0 : index
    %8 = vector.load %arg10[%c0_2, %c0_3] : memref<128x128xf32, #tpu.memory_space<vmem>>, vector<128x128xf32>
    %c0_4 = arith.constant 0 : index
    %c0_5 = arith.constant 0 : index
    %c0_6 = arith.constant 0 : index
    %9 = vector.load %arg3[%c0_4, %c0_5, %c0_6] : memref<1x128x128xbf16, #tpu.memory_space<vmem>>, vector<1x128x128xbf16>
    %10 = vector.shape_cast %9 : vector<1x128x128xbf16> to vector<128x128xbf16>
    %cst = arith.constant dense<0.000000e+00> : vector<128x128xf32>
    %11 = tpu.matmul %10, %7, %cst {dimension_numbers = #tpu.dot_dimension_numbers<[1], [0], [0], [1], [0, 0, 1, 1], [], []>} : vector<128x128xbf16>, vector<128x128xbf16>, vector<128x128xf32> -> vector<128x128xf32>
    %12 = arith.addf %8, %11 : vector<128x128xf32>
    %c0_7 = arith.constant 0 : index
    %c0_8 = arith.constant 0 : index
    %13 = vector.load %arg10[%c0_7, %c0_8] : memref<128x128xf32, #tpu.memory_space<vmem>>, vector<128x128xf32>
    tpu.vector_store %arg10[%c0_7, %c0_8], %12 {strides = array<i32>} : memref<128x128xf32, #tpu.memory_space<vmem>>, vector<128x128xf32>,
    %c0_i32_9 = arith.constant 0 : i32
    %14 = arith.cmpi eq, %arg2, %c0_i32_9 : i32
    %15 = arith.extui %14 : i1 to i32
    %c0_i32_10 = arith.constant 0 : i32
    %16 = arith.cmpi ne, %15, %c0_i32_10 : i32
    scf.if %16 {
      %c0_11 = arith.constant 0 : index
      %c0_12 = arith.constant 0 : index
      %c0_13 = arith.constant 0 : index
      %17 = vector.load %arg5[%c0_11, %c0_12, %c0_13] : memref<1x128x128xbf16, #tpu.memory_space<vmem>>, vector<1x128x128xbf16>
      %18 = vector.shape_cast %17 : vector<1x128x128xbf16> to vector<128x128xbf16>
      %c0_14 = arith.constant 0 : index
      %c0_15 = arith.constant 0 : index
      %19 = vector.load %arg6[%c0_14, %c0_15] : memref<128x128xbf16, #tpu.memory_space<vmem>>, vector<128x128xbf16>
      %cst_16 = arith.constant dense<0.000000e+00> : vector<128x128xf32>
      %20 = tpu.matmul %18, %19, %cst_16 {dimension_numbers = #tpu.dot_dimension_numbers<[1], [0], [0], [1], [0, 0, 1, 1], [], []>} : vector<128x128xbf16>, vector<128x128xbf16>, vector<128x128xf32> -> vector<128x128xf32>
      %c0_17 = arith.constant 0 : index
      %c0_18 = arith.constant 0 : index
      %21 = vector.load %arg10[%c0_17, %c0_18] : memref<128x128xf32, #tpu.memory_space<vmem>>, vector<128x128xf32>
      %22 = arith.truncf %21 : vector<128x128xf32> to vector<128x128xbf16>
      %c0_19 = arith.constant 0 : index
      %c0_20 = arith.constant 0 : index
      %23 = vector.load %arg7[%c0_19, %c0_20] : memref<128x128xbf16, #tpu.memory_space<vmem>>, vector<128x128xbf16>
      %cst_21 = arith.constant dense<0.000000e+00> : vector<128x128xf32>
      %24 = tpu.matmul %22, %23, %cst_21 {dimension_numbers = #tpu.dot_dimension_numbers<[1], [0], [0], [1], [0, 0, 1, 1], [], []>} : vector<128x128xbf16>, vector<128x128xbf16>, vector<128x128xf32> -> vector<128x128xf32>
      %25 = arith.addf %20, %24 : vector<128x128xf32>
      %c0_22 = arith.constant 0 : index
      %c0_23 = arith.constant 0 : index
      %26 = vector.load %arg8[%c0_22, %c0_23] : memref<1x128xf32, #tpu.memory_space<vmem>>, vector<1x128xf32>
      %27 = vector.broadcast %26 : vector<1x128xf32> to vector<128x128xf32>
      %28 = arith.addf %25, %27 : vector<128x128xf32>
      %cst_24 = arith.constant 0.000000e+00 : f32
      %29 = vector.broadcast %cst_24 : f32 to vector<128x128xf32>
      %30 = arith.maximumf %28, %29 : vector<128x128xf32>
      %31 = arith.truncf %30 : vector<128x128xf32> to vector<128x128xbf16>
      %c0_25 = arith.constant 0 : index
      %c0_26 = arith.constant 0 : index
      %c0_27 = arith.constant 0 : index
      %32 = vector.load %arg9[%c0_25, %c0_26, %c0_27] : memref<1x128x128xbf16, #tpu.memory_space<vmem>>, vector<1x128x128xbf16>
      %33 = vector.shape_cast %32 : vector<1x128x128xbf16> to vector<128x128xbf16>
      %34 = vector.shape_cast %31 : vector<128x128xbf16> to vector<1x128x128xbf16>
      tpu.vector_store %arg9[%c0_25, %c0_26, %c0_27], %34 {strides = array<i32>} : memref<1x128x128xbf16, #tpu.memory_space<vmem>>, vector<1x128x128xbf16>,
    } else {
    }
    return
  }
  func.func @transform_0(%arg0: i32, %arg1: i32, %arg2: i32) -> (i32, i32, i32) {
    %c0_i32 = arith.constant 0 : i32
    return %arg0, %arg1, %arg2 : i32, i32, i32
  }
  func.func @transform_1(%arg0: i32, %arg1: i32, %arg2: i32) -> (i32, i32, i32) {
    %c0_i32 = arith.constant 0 : i32
    %c0_i32_0 = arith.constant 0 : i32
    %c0_i32_1 = arith.constant 0 : i32
    return %arg0, %c0_i32, %c0_i32_0 : i32, i32, i32
  }
  func.func @transform_2(%arg0: i32, %arg1: i32, %arg2: i32) -> (i32, i32, i32) {
    %c0_i32 = arith.constant 0 : i32
    %c0_i32_0 = arith.constant 0 : i32
    return %arg0, %arg1, %c0_i32 : i32, i32, i32
  }
  func.func @transform_3(%arg0: i32, %arg1: i32, %arg2: i32) -> (i32, i32) {
    %c0_i32 = arith.constant 0 : i32
    %c0_i32_0 = arith.constant 0 : i32
    %c0_i32_1 = arith.constant 0 : i32
    return %c0_i32, %c0_i32_0 : i32, i32
  }
  func.func @transform_4(%arg0: i32, %arg1: i32, %arg2: i32) -> (i32, i32) {
    %c0_i32 = arith.constant 0 : i32
    %c0_i32_0 = arith.constant 0 : i32
    %c0_i32_1 = arith.constant 0 : i32
    return %c0_i32, %c0_i32_0 : i32, i32
  }
  func.func @transform_5(%arg0: i32, %arg1: i32, %arg2: i32) -> (i32, i32) {
    %c0_i32 = arith.constant 0 : i32
    %c0_i32_0 = arith.constant 0 : i32
    %c0_i32_1 = arith.constant 0 : i32
    return %c0_i32, %c0_i32_0 : i32, i32
  }
  func.func @transform_6(%arg0: i32, %arg1: i32, %arg2: i32) -> (i32, i32, i32) {
    %c0_i32 = arith.constant 0 : i32
    %c0_i32_0 = arith.constant 0 : i32
    return %arg0, %arg1, %c0_i32 : i32, i32, i32
  }
}

</mosaic_0001>

<bundles_post_ra>
// kernel: tpu_custom_call.1
= control target key start
LH: loop header
LB: loop body
LE: loop exit
PB: predicated region body
PF: predicated region fallthrough
CT: control target
= control target key end

     0   :  { %s2170_s0 = inlined_call_operand.hbm [shape: bf16[2,128,128], index: 0, kind: input, shape index: {}]   ;;  %s2171_s1 = inlined_call_operand.hbm [shape: bf16[2,128,128], index: 1, kind: input, shape index: {}]   ;;  %s2172_s2 = inlined_call_operand.hbm [shape: bf16[2,128,128], index: 2, kind: input, shape index: {}]   ;;  %s2173_s3 = inlined_call_operand.hbm [shape: bf16[128,128], index: 3, kind: input, shape index: {}]   ;;  %s2174_s4 = inlined_call_operand.hbm [shape: bf16[128,128], index: 4, kind: input, shape index: {}]   ;;  %s2175_s5 = inlined_call_operand.vmem [shape: f32[1,128], index: 5, kind: input, shape index: {}]   ;;  %s2176_s6 = inlined_call_operand.hbm [shape: bf16[2,128,128], index: 6, kind: output, shape index: {}]  }
   0x1   :  { %2187 = sst [smem:[#allocation23_spill]] %s2171_s1 }
   0x2   :  { %2188 = sst [smem:[#allocation24_spill]] %s2173_s3 }
   0x3   :  { %2189 = sst [smem:[#allocation25_spill]] %s2174_s4 }
   0x4   :  { %11 = vsyncpa [#allocation4], 0 }
   0x5   :  { %13 = vsyncpa [#allocation4 + $0x1], 0 }
   0x6   :  { %14 = vsyncpa [#allocation7], 0 }
   0x7   :  { %16 = vsyncpa [#allocation7 + $0x1], 0 }
   0x8   :  { %17 = vsyncpa [#allocation10], 0 }
   0x9   :  { %18 = vsyncpa [#allocation5], 0 }
   0xa   :  { %20 = vsyncpa [#allocation5 + $0x1], 0  ;;  %s1915_s21 = smov 0   ;;  %s1917_s22 = smov 0  }
   0xb   :  { %s1919_s23 = smov 0   ;;  %s1921_s24 = smov 0  }
   0xc   :  { %s1923_s25 = smov 0   ;;  %s1925_s26 = smov 0  }
   0xd LB: > { %2190 = sst [smem:[#allocation17_spill]] %s1860_s23  ;;  %s1946_s27 = sadd.s32 4294967295, %s1872_s26   ;;  %s1872_s26 = sphi %s1925_s26, %s26_s26   ;;  %s1868_s25 = sphi %s1923_s25, %s2212_s25   ;;  %s1864_s24 = sphi %s1921_s24, %s2211_s24   ;;  %s1860_s23 = sphi %s1919_s23, %s2210_s23   ;;  %s1856_s22 = sphi %s1917_s22, %s2214_s22   ;;  %s1852_s21 = sphi %s1915_s21, %s2213_s21  }
   0xe   : > { %2191 = sst [smem:[#allocation18_spill]] %s1868_s25  ;;  %s1233_s28 = sadd.s32 4294967294, %s1872_s26  }
   0xf   : > { %2192 = sst [smem:[#allocation19_spill]] %s1872_s26  ;;  %p69_p0 = scmp.ne.s32.totalorder %s1856_s22, %s1852_s21 }
  0x10   : > { %p70_p1 = scmp.eq.s32.totalorder %s1946_s27, 0  ;;  %p212_p2 = scmp.eq.s32.totalorder %s1946_s27, 1 }
  0x11   : > { %p218_p3 = scmp.eq.s32.totalorder %s1233_s28, 1  ;;  %p1234_p5 = scmp.ge.s32.totalorder %s1872_s26, 1 }
  0x12   : > { %p1955_p4 = por %p70_p1, %p69_p0  ;;  %p225_p7 = scmp.lt.s32.totalorder %s1872_s26, 3 }
  0x13   : > { %p1960_p6 = por %p218_p3, %p69_p0  ;;  %s2196_s3 = sld [smem:[#allocation24_spill]] }
  0x14   : > { %p1968_p8 = pnand %p1234_p5, %p225_p7  ;;  %s1874_s11 = smov [#allocation9]  }
  0x15   : > { %s2194_s30 = scalar_select %p1960_p6, 1, 0 }
  0x16   : > { %p1550_p9 = pneg %p1968_p8  ;;  %s238_s12 = sshll.u32 %s1874_s11, 4  ;;  %s239_s12 = int_to_ptr.vmem [resolvable:$true] %s238_s12 }
  0x17   : > { %2195 = sst [smem:[#allocation20_spill]] %s2194_s30  ;;  %p1237_p11 = scmp.ge.s32.totalorder %s1872_s26, 2 }
  0x18   : > { %p1976_p10 = pnand %p1550_p9, %p70_p1  ;;  %s2177_s14 = smov 64  }
  0x19   : > { %s236_s9 = sshll.u32 %s2196_s3, 4  ;;  %s2179_s15 = smov 4   ;;  %s237_s9 = int_to_ptr.hbm [resolvable:$true] %s236_s9 }
  0x1a   : > { %1553 = dma.hbm_to_vmem [thread:$0]  (!%p1976_p10), %s237_s9, 1024, %s239_s12, [#allocation10], %s2177_s14, %s2177_s14, %s2179_s15  }
  0x1b   : > { %s45_s16 = sadd.s32 1, %s1868_s25  ;;  %s56_s17 = sadd.s32 1, %s1860_s23 }
  0x1c   : > { %p47_p12 = scmp.ge.s32.totalorder %s45_s16, 2  ;;  %p63_p13 = scmp.ne.s32.totalorder %s1860_s23, %s1856_s22 }
  0x1d   : > { %p64_p0 = scmp.eq.s32.totalorder %s1872_s26, 0  ;;  %p1573_p7 = scmp.lt.s32.totalorder %s1872_s26, 2 }
  0x1e   : > { %s2216_s16 = smov (%p47_p12, %s45_s16), 0  ;;  %p1995_p5 = por %p212_p2, %p63_p13 }
  0x1f   : > { %2199 = sst [smem:[#allocation21_spill]] %s2216_s16  ;;  %p65_p3 = por %p64_p0, %p63_p13 }
  0x20   : > { %s49_s19 = ssub.s32 %s1868_s25, %s2216_s16  ;;  %s269_s20 = sand.u32 1, %s1860_s23  }
  0x21   : > { %p54_p9 = scmp.eq.s32.totalorder %s49_s19, 0  ;;  %s2003_s28 = sshll.u32 %s269_s20, 6 }
  0x22   : > { %s2006_s7 = sshll.u32 %s1868_s25, 6  ;;  %p2011_p12 = pnand %p1573_p7, %p65_p3 }
  0x23   : > { %s2009_s8 = scalar_select %p54_p9, %s1860_s23, %s56_s17  }
  0x24   : > { %s294_s11 = sand.u32 1, %s1872_s26   ;;  %s2203_s1 = sld [smem:[#allocation23_spill]] }
  0x25   : > { %2201 = sst [smem:[#allocation22_spill]] %s2009_s8  ;;  %s298_s3 = scalar_lea.vmem [#allocation6], %s2003_s28 }
  0x26   : > { %s306_s16 = sshll.u32 %s298_s3, 4  ;;  %s295_s17 = scalar_lea.sflag [#allocation7], %s294_s11  ;;  %s307_s16 = int_to_ptr.vmem [resolvable:$true] %s306_s16 }
  0x27   : > { %s2204_s25 = smov 4   ;;  %s2205_s8 = smov 64  }
  0x28   : > { %s2206_s4 = sld [smem:[#allocation25_spill]]  ;;  %s1877_s14 = smov [#allocation11]  }
  0x29   : > { %s252_s12 = sshll.u32 %s1877_s14, 4  ;;  %s270_s23 = scalar_lea.sflag [#allocation4], %s269_s20  ;;  %s253_s12 = int_to_ptr.vmem [resolvable:$true] %s252_s12 }
  0x2a   : > { %s303_s19 = scalar_lea.hbm %s2203_s1, %s2006_s7  ;;  %s327_s14 = scalar_lea.hbm %s2172_s2, %s2006_s7 }
  0x2b   : > { %s304_s15 = sshll.u32 %s303_s19, 4  ;;  %s281_s19 = scalar_lea.hbm %s2170_s0, %s2006_s7  ;;  %s305_s15 = int_to_ptr.hbm [resolvable:$true] %s304_s15 }
  0x2c   : > { %1563 = dma.hbm_to_vmem [thread:$0]  (!%p2011_p12), %s305_s15, 1024, %s307_s16, %s295_s17, %s2205_s8, %s2205_s8, %s2204_s25  }
  0x2d   : > { %s282_s15 = sshll.u32 %s281_s19, 4  ;;  %s273_s16 = scalar_lea.vmem [#allocation3], %s2003_s28  ;;  %s283_s15 = int_to_ptr.hbm [resolvable:$true] %s282_s15 }
  0x2e   : > { %s250_s30 = sshll.u32 %s2206_s4, 4  ;;  %s284_s1 = sshll.u32 %s273_s16, 4  ;;  %s251_s30 = int_to_ptr.hbm [resolvable:$true] %s250_s30  ;;  %s285_s1 = int_to_ptr.vmem [resolvable:$true] %s284_s1 }
  0x2f   : > { %1556 = dma.hbm_to_vmem [thread:$0]  (!%p1976_p10), %s251_s30, 1024, %s253_s12, [#allocation10], %s2205_s8, %s2205_s8, %s2204_s25  }
  0x30   : > { %1560 = dma.hbm_to_vmem [thread:$0]  (!%p2011_p12), %s283_s15, 1024, %s285_s1, %s270_s23, %s2205_s8, %s2205_s8, %s2204_s25  }
  0x31   : > { %s328_s30 = sshll.u32 %s327_s14, 4  ;;  %s320_s12 = scalar_lea.vmem [#allocation8], %s2003_s28  ;;  %s329_s30 = int_to_ptr.hbm [resolvable:$true] %s328_s30 }
  0x32   : > { %s330_s4 = sshll.u32 %s320_s12, 4  ;;  %342 = sbr.rel (%p1968_p8) target bundleno = 455 (0x1c7), region = 44  ;;  %s331_s4 = int_to_ptr.vmem [resolvable:$true] %s330_s4 }
  0x33   : > { %1566 = dma.hbm_to_vmem [thread:$0]  (!%p2011_p12), %s329_s30, 1024, %s331_s4, %s295_s17, %s2205_s8, %s2205_s8, %s2204_s25  }
  0x34   : > { %s2057_s1 = sand.u32 (!%p1968_p8), 1, %s1856_s22  }
  0x35   : > { %s2060_s20 = sshll.u32 (!%p1968_p8), %s2057_s1, 6  ;;  %s345_s28 = scalar_lea.sflag (!%p1968_p8), [#allocation4], %s2057_s1 }
  0x36   : > { %s2064_s7 = scalar_lea.vmem (!%p1968_p8), [#allocation3], %s2060_s20 }
  0x37   : > { %1835 = dma.done.wait (%p1955_p4), %s345_s28, 1024  }
  0x38   : > { %1837 = vsyncadd (%p1955_p4), %s345_s28, 4294966272  ;;  %s354_s4 = sand.u32 1, %s1946_s27   ;;  %s358_s10 = scalar_lea.vmem [#allocation6], %s2060_s20 }
  0x39   : > { %s355_s25 = scalar_lea.sflag [#allocation7], %s354_s4 }
  0x3a   : > { %1839 = dma.done.wait (%p1955_p4), %s355_s25, 2048  }
  0x3b   : > { %1841 = vsyncadd (%p1955_p4), %s355_s25, 4294965248  ;;  %s2077_s8 = scalar_lea.vmem [#allocation8], %s2060_s20 }
  0x3c   : > { %1843 = dma.done.wait (%p70_p1), [#allocation10], 2048  }
  0x3d   : > { %1845 = vsyncadd (%p70_p1), [#allocation10], 4294965248  ;;  %v1429_v0 = vld [vmem:[%s358_s10 + $0x38] sm:$0xff]  ;;  %v1428_v1 = vld [vmem:[%s358_s10 + $0x30] sm:$0xff]  ;;  %s2107_s9 = scalar_lea.vmem [#allocation12], %s2060_s20  ;;  %s1462_s17 = sshll.u32 %s1864_s24, 6 }
  0x3e   : > { %590 = vmatpush.bf16.msra.mxu0 %v1429_v0  ;;  %1510 = vmatpush.bf16.msra.mxu3 %v1429_v0  ;;  %v1427_v2 = vld [vmem:[%s358_s10 + $0x28] sm:$0xff]  ;;  %v1426_v3 = vld [vmem:[%s358_s10 + $0x20] sm:$0xff]  ;;  %v1425_v4 = vld [vmem:[%s358_s10 + $0x18] sm:$0xff]  ;;  %s1070_s19 = scalar_lea.hbm %s2176_s6, %s1462_s17  ;;  %s1071_s15 = sshll.u32 %s2107_s9, 4  ;;  %s1072_s15 = int_to_ptr.vmem [resolvable:$true] %s1071_s15 }
  0x3f   : > { %v1424_v5 = vld [vmem:[%s358_s10 + $0x10] sm:$0xff]  ;;  %v1423_v6 = vld [vmem:[%s358_s10 + $0x8] sm:$0xff]  ;;  %v1422_v7 = vld [vmem:[%s358_s10] sm:$0xff]  ;;  %s1073_s16 = sshll.u32 %s1070_s19, 4  ;;  %s1057_s24 = scalar_lea.sflag [#allocation5], %s2057_s1  ;;  %s1074_s16 = int_to_ptr.hbm [resolvable:$true] %s1073_s16 }
  0x40   : > { %v1430_v8 = vld [vmem:[%s2064_s7] sm:$0xff]  ;;  %v1436_v9 = vld [vmem:[%s2064_s7 + $0x30] sm:$0xff]  ;;  %v1431_v10 = vld [vmem:[%s2064_s7 + $0x8] sm:$0xff]  ;;  %s1796_s23 = sshra.s32 %s1074_s16, 4  ;;  %s1802_s30 = scalar_lea.hbm %s2176_s6, 128  ;;  %s1797_s23 = int_to_ptr.hbm [resolvable:$true] %s1796_s23 }
  0x41   : > { %v1437_v11 = vld [vmem:[%s2064_s7 + $0x38] sm:$0xff]  ;;  %v1432_v12 = vld [vmem:[%s2064_s7 + $0x10] sm:$0xff]  ;;  %v1451_v18 = vld [vmem:[#allocation9 + $0x28] sm:$0xff]  ;;  %s1798_s26 = scalar_lea.hbm %s1797_s23, 64  ;;  %p1803_p8 = scmp.lt.s32.totalorder %s1797_s23, %s2176_s6 }
  0x42   : > { %591 = vmatpush.bf16.msra.mxu0 %v1428_v1  ;;  %1511 = vmatpush.bf16.msra.mxu3 %v1428_v1  ;;  %v1433_v13 = vld [vmem:[%s2064_s7 + $0x18] sm:$0xff]  ;;  %v1452_v16 = vld [vmem:[#allocation9 + $0x30] sm:$0xff]  ;;  %v1459_v19 = vld [vmem:[#allocation11 + $0x28] sm:$0xff]  ;;  %p1799_p1 = scmp.ne.s32.totalorder %s1797_s23, %s1798_s26  ;;  %p1804_p10 = scmp.lt.s32.totalorder %s1802_s30, %s1798_s26 }
  0x43   : > { %v1453_v14 = vld [vmem:[#allocation9 + $0x38] sm:$0xff]  ;;  %v1460_v17 = vld [vmem:[#allocation11 + $0x30] sm:$0xff]  ;;  %v1450_v20 = vld [vmem:[#allocation9 + $0x20] sm:$0xff] }
  0x44   : > { %v1461_v15 = vld [vmem:[#allocation11 + $0x38] sm:$0xff]  ;;  %939 = vmatpush.bf16.msra.mxu2 %v1453_v14  ;;  %v1458_v21 = vld [vmem:[#allocation11 + $0x20] sm:$0xff]  ;;  %v1448_v25 = vld [vmem:[#allocation9 + $0x10] sm:$0xff]  ;;  %p1800_p2 = pnand %p1799_p1, %p1995_p5  ;;  %p1805_p13 = por %p1804_p10, %p1803_p8 }
  0x45   : > { %794 = vmatpush.bf16.msra.mxu1 %v1461_v15  ;;  %v1434_v22 = vld [vmem:[%s2064_s7 + $0x20] sm:$0xff]  ;;  %v1449_v23 = vld [vmem:[#allocation9 + $0x18] sm:$0xff]  ;;  %v1447_v26 = vld [vmem:[#allocation9 + $0x8] sm:$0xff] }
  0x46   : > { %592 = vmatpush.bf16.msra.mxu0 %v1427_v2  ;;  %1512 = vmatpush.bf16.msra.mxu3 %v1427_v2  ;;  %v1457_v24 = vld [vmem:[#allocation11 + $0x18] sm:$0xff]  ;;  %v1446_v27 = vld [vmem:[#allocation9] sm:$0xff]  ;;  %v1435_v28 = vld [vmem:[%s2064_s7 + $0x28] sm:$0xff]  ;;  %p1801_p4 = pneg %p1800_p2 }
  0x47   : > { %v1438_v29 = vld [vmem:[%s2077_s8] sm:$0xff]  ;;  %v1456_v30 = vld [vmem:[#allocation11 + $0x10] sm:$0xff]  ;;  %v1455_v31 = vld [vmem:[#allocation11 + $0x8] sm:$0xff] }
  0x48   : > { %940 = vmatpush.bf16.msra.mxu2 %v1452_v16  ;;  %v1454_v32 = vld [vmem:[#allocation11] sm:$0xff]  ;;  %v1439_v33 = vld [vmem:[%s2077_s8 + $0x8] sm:$0xff]  ;;  %v1440_v34 = vld [vmem:[%s2077_s8 + $0x10] sm:$0xff]  ;;  %p1806_p0 = pnand %p1805_p13, %p1801_p4 }
  0x49   : > { %795 = vmatpush.bf16.msra.mxu1 %v1460_v17  ;;  %v1441_v39 = vld [vmem:[%s2077_s8 + $0x18] sm:$0xff]  ;;  %v1442_v46 = vld [vmem:[%s2077_s8 + $0x20] sm:$0xff]  ;;  %v1443_v52 = vld [vmem:[%s2077_s8 + $0x28] sm:$0xff] }
  0x4a   : > { %593 = vmatpush.bf16.msra.mxu0 %v1426_v3  ;;  %1513 = vmatpush.bf16.msra.mxu3 %v1426_v3  ;;  %v1444_v53 = vld [vmem:[%s2077_s8 + $0x30] sm:$0xff]  ;;  %v1445_v57 = vld [vmem:[%s2077_s8 + $0x38] sm:$0xff] }
  0x4c   : > { %941 = vmatpush.bf16.msra.mxu2 %v1451_v18 }
  0x4d   : > { %796 = vmatpush.bf16.msra.mxu1 %v1459_v19 }
  0x4e   : > { %594 = vmatpush.bf16.msra.mxu0 %v1425_v4  ;;  %1514 = vmatpush.bf16.msra.mxu3 %v1425_v4 }
  0x50   : > { %942 = vmatpush.bf16.msra.mxu2 %v1450_v20 }
  0x51   : > { %797 = vmatpush.bf16.msra.mxu1 %v1458_v21 }
  0x52   : > { %595 = vmatpush.bf16.msra.mxu0 %v1424_v5  ;;  %1515 = vmatpush.bf16.msra.mxu3 %v1424_v5  ;;  %v2102_v5 = vld [vmem:[%s2175_s5] ss:$0 sm:$0xff] }
  0x54   : > { %943 = vmatpush.bf16.msra.mxu2 %v1449_v23 }
  0x55   : > { %798 = vmatpush.bf16.msra.mxu1 %v1457_v24 }
  0x56   : > { %596 = vmatpush.bf16.msra.mxu0 %v1423_v6  ;;  %1516 = vmatpush.bf16.msra.mxu3 %v1423_v6 }
  0x58   : > { %944 = vmatpush.bf16.msra.mxu2 %v1448_v25 }
  0x59   : > { %799 = vmatpush.bf16.msra.mxu1 %v1456_v30 }
  0x5a   : > { %597 = vmatpush.bf16.msra.mxu0 %v1422_v7  ;;  %1517 = vmatpush.bf16.msra.mxu3 %v1422_v7 }
  0x5c   : > { %945 = vmatpush.bf16.msra.mxu2 %v1447_v26 }
  0x5d   : > { %598 = vmatmul.bf16.vlgmr.msra.gmra.mxu0 %v1430_v8  ;;  %628 = vmatmul.bf16.vlgmr.msra.gmra.mxu3 %v1436_v9 }
  0x5e   : > { %1518 = vmatpush.bf16.msrb.mxu3 %v1461_v15  ;;  %800 = vmatpush.bf16.msra.mxu1 %v1455_v31 }
  0x60   : > { %946 = vmatpush.bf16.msra.mxu2 %v1446_v27 }
  0x62   : > { %1519 = vmatpush.bf16.msrb.mxu3 %v1460_v17  ;;  %801 = vmatpush.bf16.msra.mxu1 %v1454_v32 }
  0x63   : > { %947 = vmatmul.bf16.vlgmr.msra.gmra.mxu2 %v1438_v29 }
  0x66   : > { %1520 = vmatpush.bf16.msrb.mxu3 %v1459_v19 }
  0x6a   : > { %1521 = vmatpush.bf16.msrb.mxu3 %v1458_v21 }
  0x6d   : > { %603 = vmatmul.bf16.gmra.mxu0 %v1431_v10  ;;  %633 = vmatmul.bf16.gmra.mxu3 %v1437_v11 }
  0x6e   : > { %1522 = vmatpush.bf16.msrb.mxu3 %v1457_v24 }
  0x72   : > { %1523 = vmatpush.bf16.msrb.mxu3 %v1456_v30 }
  0x73   : > { %952 = vmatmul.bf16.gmra.mxu2 %v1439_v33 }
  0x76   : > { %1524 = vmatpush.bf16.msrb.mxu3 %v1455_v31 }
  0x7a   : > { %1525 = vmatpush.bf16.msrb.mxu3 %v1454_v32 }
  0x7d   : > { %608 = vmatmul.bf16.gmra.mxu0 %v1432_v12 }
  0x7e   : > { %1526 = vmatpush.bf16.msra.mxu3 %v1453_v14 }
  0x82   : > { %1527 = vmatpush.bf16.msra.mxu3 %v1452_v16 }
  0x83   : > { %957 = vmatmul.bf16.gmra.mxu2 %v1440_v34 }
  0x86   : > { %1528 = vmatpush.bf16.msra.mxu3 %v1451_v18 }
  0x8a   : > { %1529 = vmatpush.bf16.msra.mxu3 %v1450_v20 }
  0x8d   : > { %613 = vmatmul.bf16.gmra.mxu0 %v1433_v13 }
  0x8e   : > { %1530 = vmatpush.bf16.msra.mxu3 %v1449_v23 }
  0x92   : > { %1531 = vmatpush.bf16.msra.mxu3 %v1448_v25 }
  0x93   : > { %962 = vmatmul.bf16.gmra.mxu2 %v1441_v39 }
  0x96   : > { %1532 = vmatpush.bf16.msra.mxu3 %v1447_v26 }
  0x9a   : > { %1533 = vmatpush.bf16.msra.mxu3 %v1446_v27 }
  0x9d   : > { %618 = vmatmul.bf16.gmra.mxu0 %v1434_v22 }
  0xa3   : > { %967 = vmatmul.bf16.gmra.mxu2 %v1442_v46 }
  0xad   : > { %623 = vmatmul.bf16.gmra.mxu0 %v1435_v28 }
  0xb3   : > { %972 = vmatmul.bf16.gmra.mxu2 %v1443_v52 }
  0xda   : > { %v599_v35 = vpop.f32.mrf.mxu0 }
  0xe0   : > { %v629_v36 = vpop.f32.mrf.mxu3 }
  0xe2   : > { %v601_v37 = vpop.f32.mrf.mxu0 }
  0xe3   : > { %v722_v38 = vpack.c.bf16 %v601_v37, %v599_v35 }
  0xe5   : > { %802 = vmatmul.bf16.vlgmr.msra.gmra.mxu1 %v722_v38 }
  0xe6   : > { %v948_v0 = vpop.f32.mrf.mxu2 }
  0xe8   : > { %v631_v40 = vpop.f32.mrf.mxu3 }
  0xe9   : > { %v728_v41 = vpack.c.bf16 %v631_v40, %v629_v36 }
  0xea   : > { %v604_v42 = vpop.f32.mrf.mxu0 }
  0xeb   : > { %832 = vmatmul.bf16.vlgmr.msrb.gmra.mxu3 %v728_v41 }
  0xee   : > { %v950_v1 = vpop.f32.mrf.mxu2 }
  0xf0   : > { %v634_v43 = vpop.f32.mrf.mxu3 }
  0xf2   : > { %v606_v44 = vpop.f32.mrf.mxu0 }
  0xf3   : > { %v723_v45 = vpack.c.bf16 %v606_v44, %v604_v42 }
  0xf5   : > { %807 = vmatmul.bf16.gmra.mxu1 %v723_v45 }
  0xf6   : > { %v953_v2 = vpop.f32.mrf.mxu2 }
  0xf8   : > { %v636_v47 = vpop.f32.mrf.mxu3 }
  0xf9   : > { %v729_v48 = vpack.c.bf16 %v636_v47, %v634_v43 }
  0xfa   : > { %v609_v49 = vpop.f32.mrf.mxu0 }
  0xfb   : > { %837 = vmatmul.bf16.gmra.mxu3 %v729_v48 }
  0xfe   : > { %v955_v7 = vpop.f32.mrf.mxu2 }
 0x102   : > { %v611_v50 = vpop.f32.mrf.mxu0 }
 0x103   : > { %v724_v51 = vpack.c.bf16 %v611_v50, %v609_v49 }
 0x105   : > { %812 = vmatmul.bf16.gmra.mxu1 %v724_v51 }
 0x106   : > { %v958_v16 = vpop.f32.mrf.mxu2 }
 0x10a   : > { %v614_v54 = vpop.f32.mrf.mxu0 }
 0x10b   : > { %977 = vmatmul.bf16.vlgmr.msra.gmra.mxu3 %v1444_v53 }
 0x10e   : > { %v960_v24 = vpop.f32.mrf.mxu2 }
 0x112   : > { %v616_v55 = vpop.f32.mrf.mxu0 }
 0x113   : > { %v725_v56 = vpack.c.bf16 %v616_v55, %v614_v54 }
 0x115   : > { %817 = vmatmul.bf16.gmra.mxu1 %v725_v56 }
 0x116   : > { %v963_v31 = vpop.f32.mrf.mxu2 }
 0x11a   : > { %v619_v58 = vpop.f32.mrf.mxu0 }
 0x11b   : > { %982 = vmatmul.bf16.gmra.mxu3 %v1445_v57 }
 0x11e   : > { %v965_v41 = vpop.f32.mrf.mxu2 }
 0x122   : > { %v621_v59 = vpop.f32.mrf.mxu0 }
 0x123   : > { %v726_v60 = vpack.c.bf16 %v621_v59, %v619_v58 }
 0x125   : > { %822 = vmatmul.bf16.gmra.mxu1 %v726_v60 }
 0x126   : > { %v968_v53 = vpop.f32.mrf.mxu2 }
 0x12a   : > { %v624_v61 = vpop.f32.mrf.mxu0 }
 0x132   : > { %v626_v62 = vpop.f32.mrf.mxu0 }
 0x133   : > { %v727_v63 = vpack.c.bf16 %v626_v62, %v624_v61  ;;  %v970_v62 = vpop.f32.mrf.mxu2 }
 0x135   : > { %827 = vmatmul.bf16.gmra.mxu1 %v727_v63 }
 0x162   : > { %v803_v3 = vpop.f32.mrf.mxu1 }
 0x163   : > { %v949_v4 = vadd.f32 %v948_v0, %v803_v3 }
 0x165   : > { %v992_v8 = vadd.f32 %v2102_v5, %v949_v4 }
 0x167   : > { %v1008_v12 = vmax.f32 %v992_v8, 0.0 }
 0x16a   : > { %v805_v6 = vpop.f32.mrf.mxu1 }
 0x16b   : > { %v951_v9 = vadd.f32 %v950_v1, %v805_v6 }
 0x16d   : > { %v993_v10 = vadd.f32 %v2102_v5, %v951_v9 }
 0x16e   : > { %v833_v11 = vpop.f32.mrf.mxu3 }
 0x16f   : > { %v1009_v13 = vmax.f32 %v993_v10, 0.0 }
 0x171   : > { %v1466_v14 = vpack.c.bf16 %v1009_v13, %v1008_v12 }
 0x172   : > { %v808_v15 = vpop.f32.mrf.mxu1 }
 0x173   : > { %1467 = vst [vmem:[%s2107_s9] sm:$0xff] %v1466_v14   ;;  %v954_v18 = vadd.f32 %v953_v2, %v808_v15  ;;  %v973_v14 = vpop.f32.mrf.mxu2 }
 0x175   : > { %v994_v20 = vadd.f32 %v2102_v5, %v954_v18 }
 0x176   : > { %v835_v17 = vpop.f32.mrf.mxu3 }
 0x177   : > { %v1010_v25 = vmax.f32 %v994_v20, 0.0 }
 0x17a   : > { %v810_v19 = vpop.f32.mrf.mxu1 }
 0x17b   : > { %v956_v21 = vadd.f32 %v955_v7, %v810_v19  ;;  %v975_v18 = vpop.f32.mrf.mxu2 }
 0x17d   : > { %v995_v22 = vadd.f32 %v2102_v5, %v956_v21 }
 0x17e   : > { %v838_v23 = vpop.f32.mrf.mxu3 }
 0x17f   : > { %v1011_v26 = vmax.f32 %v995_v22, 0.0 }
 0x181   : > { %v1471_v27 = vpack.c.bf16 %v1011_v26, %v1010_v25 }
 0x182   : > { %v813_v28 = vpop.f32.mrf.mxu1 }
 0x183   : > { %1503 = vst [vmem:[%s2107_s9 + $0x8] sm:$0xff] %v1471_v27   ;;  %v959_v30 = vadd.f32 %v958_v16, %v813_v28 }
 0x185   : > { %v996_v33 = vadd.f32 %v2102_v5, %v959_v30 }
 0x186   : > { %v840_v29 = vpop.f32.mrf.mxu3 }
 0x187   : > { %v1012_v37 = vmax.f32 %v996_v33, 0.0 }
 0x18a   : > { %v815_v32 = vpop.f32.mrf.mxu1 }
 0x18b   : > { %v961_v34 = vadd.f32 %v960_v24, %v815_v32 }
 0x18d   : > { %v997_v35 = vadd.f32 %v2102_v5, %v961_v34 }
 0x18e   : > { %v978_v36 = vpop.f32.mrf.mxu3 }
 0x18f   : > { %v1013_v38 = vmax.f32 %v997_v35, 0.0  ;;  %v979_v42 = vadd.f32 %v978_v36, %v833_v11 }
 0x191   : > { %v1476_v39 = vpack.c.bf16 %v1013_v38, %v1012_v37  ;;  %v1004_v44 = vadd.f32 %v2102_v5, %v979_v42 }
 0x192   : > { %v818_v40 = vpop.f32.mrf.mxu1 }
 0x193   : > { %1504 = vst [vmem:[%s2107_s9 + $0x10] sm:$0xff] %v1476_v39   ;;  %v964_v45 = vadd.f32 %v963_v31, %v818_v40  ;;  %v1020_v49 = vmax.f32 %v1004_v44, 0.0 }
 0x195   : > { %v998_v50 = vadd.f32 %v2102_v5, %v964_v45 }
 0x196   : > { %v980_v43 = vpop.f32.mrf.mxu3 }
 0x197   : > { %v981_v46 = vadd.f32 %v980_v43, %v835_v17  ;;  %v1014_v57 = vmax.f32 %v998_v50, 0.0 }
 0x199   : > { %v1005_v47 = vadd.f32 %v2102_v5, %v981_v46 }
 0x19a   : > { %v820_v48 = vpop.f32.mrf.mxu1 }
 0x19b   : > { %v1021_v51 = vmax.f32 %v1005_v47, 0.0  ;;  %v966_v52 = vadd.f32 %v965_v41, %v820_v48 }
 0x19d   : > { %v1496_v54 = vpack.c.bf16 %v1021_v51, %v1020_v49  ;;  %v999_v55 = vadd.f32 %v2102_v5, %v966_v52 }
 0x19e   : > { %v983_v56 = vpop.f32.mrf.mxu3 }
 0x19f   : > { %1508 = vst [vmem:[%s2107_s9 + $0x30] sm:$0xff] %v1496_v54   ;;  %v1015_v58 = vmax.f32 %v999_v55, 0.0  ;;  %v984_v61 = vadd.f32 %v983_v56, %v838_v23 }
 0x1a1   : > { %v1481_v59 = vpack.c.bf16 %v1015_v58, %v1014_v57  ;;  %v1006_v0 = vadd.f32 %v2102_v5, %v984_v61 }
 0x1a2   : > { %v823_v60 = vpop.f32.mrf.mxu1 }
 0x1a3   : > { %1505 = vst [vmem:[%s2107_s9 + $0x18] sm:$0xff] %v1481_v59   ;;  %v969_v1 = vadd.f32 %v968_v53, %v823_v60  ;;  %v1022_v6 = vmax.f32 %v1006_v0, 0.0 }
 0x1a5   : > { %v1000_v7 = vadd.f32 %v2102_v5, %v969_v1 }
 0x1a6   : > { %v985_v63 = vpop.f32.mrf.mxu3 }
 0x1a7   : > { %v986_v2 = vadd.f32 %v985_v63, %v840_v29  ;;  %v1016_v12 = vmax.f32 %v1000_v7, 0.0 }
 0x1a9   : > { %v1007_v3 = vadd.f32 %v2102_v5, %v986_v2 }
 0x1aa   : > { %v825_v4 = vpop.f32.mrf.mxu1 }
 0x1ab   : > { %v1023_v8 = vmax.f32 %v1007_v3, 0.0  ;;  %v971_v9 = vadd.f32 %v970_v62, %v825_v4 }
 0x1ad   : > { %v1501_v10 = vpack.c.bf16 %v1023_v8, %v1022_v6  ;;  %v1001_v11 = vadd.f32 %v2102_v5, %v971_v9 }
 0x1af   : > { %1509 = vst [vmem:[%s2107_s9 + $0x38] sm:$0xff] %v1501_v10   ;;  %v1017_v13 = vmax.f32 %v1001_v11, 0.0 }
 0x1b1   : > { %v1486_v15 = vpack.c.bf16 %v1017_v13, %v1016_v12 }
 0x1b2   : > { %v828_v16 = vpop.f32.mrf.mxu1 }
 0x1b3   : > { %1506 = vst [vmem:[%s2107_s9 + $0x20] sm:$0xff] %v1486_v15   ;;  %v974_v17 = vadd.f32 %v973_v14, %v828_v16 }
 0x1b5   : > { %v1002_v20 = vadd.f32 %v2102_v5, %v974_v17 }
 0x1b7   : > { %v1018_v23 = vmax.f32 %v1002_v20, 0.0 }
 0x1ba   : > { %v830_v19 = vpop.f32.mrf.mxu1 }
 0x1bb   : > { %v976_v21 = vadd.f32 %v975_v18, %v830_v19 }
 0x1bd   : > { %v1003_v22 = vadd.f32 %v2102_v5, %v976_v21 }
 0x1bf   : > { %v1019_v24 = vmax.f32 %v1003_v22, 0.0 }
 0x1c1   : > { %v1491_v25 = vpack.c.bf16 %v1019_v24, %v1018_v23 }
 0x1c3   : > { %1507 = vst [vmem:[%s2107_s9 + $0x28] sm:$0xff] %v1491_v25  }
 0x1c4   : > { %1809 = shalt.err (!%p1806_p0)
}
 0x1c5   : > { %s1878_s1 = smov 64   ;;  %s1879_s28 = smov 4  }
 0x1c6   : > { %1548 = dma.vmem_to_hbm [thread:$0]  (%p1995_p5), %s1072_s15, 1024, %s1074_s16, %s1057_s24, %s1878_s1, %s1878_s1, %s1879_s28  }
 0x1c7 PF: > { %s2208_s4 = sld [smem:[#allocation19_spill]]  ;;  %s1088_s25 = sand.u32 1, %s1852_s21  }
 0x1c8   : > { %p1568_p3 = pnand %p1237_p11, %p1960_p6  ;;  %s1089_s10 = scalar_lea.sflag [#allocation5], %s1088_s25 }
 0x1ca   : > { %p1569_p7 = pneg %p1568_p3 }
 0x1cc   : > { %1847 = dma.done.wait (%p1569_p7), %s1089_s10, 1024  }
 0x1cd   : > { %1849 = vsyncadd (%p1569_p7), %s1089_s10, 4294966272  ;;  %s26_s26 = sadd.s32 1, %s2208_s4   ;;  %s2209_s8 = sld [smem:[#allocation17_spill]] }
 0x1ce   : > { %p23_p9 = scmp.ge.s32.totalorder %s26_s26, 4   ;;  %s2210_s23 = sld [smem:[#allocation22_spill]] }
 0x1cf   : > { %s2211_s24 = sld [smem:[#allocation18_spill]]  ;;  %s2213_s21 = smov %s1856_s22 }
 0x1d0   : > { %s2212_s25 = sld [smem:[#allocation21_spill]]  ;;  %25 = sbr.rel (!%p23_p9) target bundleno = 13 (0xd), region = 130 }
 0x1d3   : > { %s2214_s22 = smov %s2209_s8 }
 0x1d5   :  { %1095 = vsyncpa [#allocation4], 1 }
 0x1d6   :  { %1097 = vsyncpa [#allocation4 + $0x1], 1 }
 0x1d7   :  { %1098 = vsyncpa [#allocation7], 1 }
 0x1d8   :  { %1100 = vsyncpa [#allocation7 + $0x1], 1 }
 0x1d9   :  { %1101 = vsyncpa [#allocation10], 1 }
 0x1da   :  { %1102 = vsyncpa [#allocation5], 1 }
 0x1db   :  { %1104 = vsyncpa [#allocation5 + $0x1], 1 }

</bundles_post_ra>
